<compile_context>
chip_gen: v7x
topology: tpu7x:2x2x1
jax: 0.10.0
libtpu: 0.0.40
codegen_flags: <defaults>
</compile_context>

<pallas_src>
import functools

import jax
import jax.numpy as jnp
from jax.experimental import pallas as pl
from jax.experimental.pallas import tpu as pltpu


def _cross_attention_kernel(xq_ref, xkc_ref, xkn_ref, wqk_ref, u_ref, wv_ref,
                            bv_ref, o_ref, m_ref, l_ref, acc_ref, g_ref, *,
                            approx_recip):
    ki = pl.program_id(2)
    cd = wqk_ref.dtype                       # MXU compute dtype (bf16 or f32)

    @pl.when(ki == 0)
    def _init():
        m_ref[...] = jnp.full_like(m_ref, -jnp.inf)
        l_ref[...] = jnp.zeros_like(l_ref)
        acc_ref[...] = jnp.zeros_like(acc_ref)
        # Folded Q/K projection of this query tile (computed once per (b, q-tile)):
        #   g[:, i] = Wk^T Wq x_i + Wk^T bq   so that   scores[j, i] = x_j . g[:, i].
        xq_c = xq_ref[0].astype(cd)
        g_ref[...] = (jnp.dot(wqk_ref[...], xq_c,
                              preferred_element_type=jnp.float32)
                      + u_ref[...]).astype(g_ref.dtype)

    xk_c = xkc_ref[0].astype(cd)             # (C, tk)  channels-major key/value tile
    xk_n = xkn_ref[0].astype(cd)             # (tk, C)  row-major copy for score LHS

    # Value projection, channels-major (keys on the lane axis):  v = Wv x_k + bv.
    v = jnp.dot(wv_ref[...], xk_c, preferred_element_type=jnp.float32) + bv_ref[...]

    # Transposed scores: s_t[j, i] = q_i . k_j (softmax-invariant bias terms dropped).
    s_t = jnp.dot(xk_n, g_ref[...], preferred_element_type=jnp.float32)   # (tk, tq)

    # Online softmax over the key axis (axis 0 -> statistics live on the lane axis,
    # so all rescales broadcast cleanly over the (C, tq) accumulator).
    m_prev = m_ref[...]
    m_new = jnp.maximum(m_prev, jnp.max(s_t, axis=0, keepdims=True))      # (1, tq)
    alpha = jnp.exp(m_prev - m_new)
    p_t = jnp.exp(s_t - m_new)                                            # (tk, tq)
    l_ref[...] = alpha * l_ref[...] + jnp.sum(p_t, axis=0, keepdims=True)
    m_ref[...] = m_new
    acc_ref[...] = alpha * acc_ref[...] + jnp.dot(
        v.astype(cd), p_t.astype(cd), preferred_element_type=jnp.float32)  # (C, tq)

    @pl.when(ki == pl.num_programs(2) - 1)
    def _finalize():
        inv_l = pl.reciprocal(l_ref[...], approx=approx_recip)            # (1, tq)
        o_ref[0] = (acc_ref[...] * inv_l + xq_ref[0]).astype(o_ref.dtype)


def _pick_tile(n):
    for t in (512, 256, 128):
        if n % t == 0:
            return t
    # Small (or 128-ragged) N: fall back to a single full-N tile.
    # TODO(synk): pad + mask the key axis for very large N not divisible by 128.
    return n


def cross_attention(x, wq, bq, wk, bk, wv, bv, *, compute_dtype=jnp.bfloat16):
    """x: (B, C, D, H, W) f32 NCDHW.  wq/wk: (Cq, C); wv: (C, C); biases 1-D."""
    B, C, D, H, W = x.shape
    N = D * H * W
    t = _pick_tile(N)
    nq = nk = N // t

    # NCDHW -> (B, C, N) is a pure reshape (no data movement).  The single real
    # transpose below only feeds the key side of the score matmul so every dot in
    # the kernel is a canonical MXU matmul; the output path has no transpose.
    x_cn = x.reshape(B, C, N)
    x_nc = jnp.transpose(x_cn, (0, 2, 1))

    # Q/K fold: M = Wk^T Wq, u = Wk^T bq (i-only / constant bias terms cancel in
    # the softmax over the key index j).
    m_qk = (wk.T @ wq).astype(compute_dtype)                  # (C, C)
    u = (wk.T @ bq).reshape(C, 1).astype(jnp.float32)         # (C, 1)
    wv_m = wv.astype(compute_dtype)                           # (C, C)
    bv_c = bv.reshape(C, 1).astype(jnp.float32)               # (C, 1)

    kernel = functools.partial(
        _cross_attention_kernel,
        approx_recip=(jnp.dtype(compute_dtype) != jnp.dtype(jnp.float32)))

    out_cn = pl.pallas_call(
        kernel,
        out_shape=jax.ShapeDtypeStruct((B, C, N), x.dtype),
        grid_spec=pltpu.PrefetchScalarGridSpec(
            num_scalar_prefetch=0,
            grid=(B, nq, nk),                                  # kv (reduction) axis last
            in_specs=[
                pl.BlockSpec((1, C, t), lambda b, qi, ki: (b, 0, qi)),   # x, query tile
                pl.BlockSpec((1, C, t), lambda b, qi, ki: (b, 0, ki)),   # x, key/value tile
                pl.BlockSpec((1, t, C), lambda b, qi, ki: (b, ki, 0)),   # x^T, key tile
                pl.BlockSpec((C, C), lambda b, qi, ki: (0, 0)),          # Wk^T Wq
                pl.BlockSpec((C, 1), lambda b, qi, ki: (0, 0)),          # Wk^T bq
                pl.BlockSpec((C, C), lambda b, qi, ki: (0, 0)),          # Wv
                pl.BlockSpec((C, 1), lambda b, qi, ki: (0, 0)),          # bv
            ],
            out_specs=pl.BlockSpec((1, C, t), lambda b, qi, ki: (b, 0, qi)),
            scratch_shapes=[
                pltpu.VMEM((1, t), jnp.float32),      # running max  m
                pltpu.VMEM((1, t), jnp.float32),      # running sum  l
                pltpu.VMEM((C, t), jnp.float32),      # output accumulator
                pltpu.VMEM((C, t), compute_dtype),    # folded query projection g
            ],
        ),
        compiler_params=pltpu.CompilerParams(
            dimension_semantics=("parallel", "parallel", "arbitrary")),
    )(x_cn, x_cn, x_nc, m_qk, u, wv_m, bv_c)

    return out_cn.reshape(B, C, D, H, W)


def cross_attention_ref(x, wq, bq, wk, bk, wv, bv):
    """Pure-JAX reference mirroring the PyTorch forward exactly (no folding)."""
    B, C, D, H, W = x.shape
    N = D * H * W
    x_cn = x.reshape(B, C, N)
    q = jnp.einsum("oc,bcn->bon", wq, x_cn) + bq[None, :, None]   # (B, Cq, N)
    k = jnp.einsum("oc,bcn->bon", wk, x_cn) + bk[None, :, None]   # (B, Cq, N)
    v = jnp.einsum("oc,bcn->bon", wv, x_cn) + bv[None, :, None]   # (B, C, N)
    attn = jnp.einsum("bci,bcj->bij", q, k)                       # (B, N, N)
    attn = jax.nn.softmax(attn, axis=-1)
    out = jnp.einsum("bcj,bij->bci", v, attn)                     # value @ attn^T
    return out.reshape(B, C, D, H, W) + x


if __name__ == "__main__":
    B, C = 2, 32
    reduction = 8
    Cq = C // reduction
    D = H = W = 4

    key = jax.random.PRNGKey(0)
    kx, kwq, kbq, kwk, kbk, kwv, kbv = jax.random.split(key, 7)

    x = jax.random.normal(kx, (B, C, D, H, W), dtype=jnp.float32)
    # Conv3d(kernel_size=1) weights stored as (C_out, C_in); biases (C_out,).
    wq = 0.1 * jax.random.normal(kwq, (Cq, C), dtype=jnp.float32)
    bq = 0.1 * jax.random.normal(kbq, (Cq,), dtype=jnp.float32)
    wk = 0.1 * jax.random.normal(kwk, (Cq, C), dtype=jnp.float32)
    bk = 0.1 * jax.random.normal(kbk, (Cq,), dtype=jnp.float32)
    wv = 0.1 * jax.random.normal(kwv, (C, C), dtype=jnp.float32)
    bv = 0.1 * jax.random.normal(kbv, (C,), dtype=jnp.float32)

    ref = cross_attention_ref(x, wq, bq, wk, bk, wv, bv)

    # Exact path (f32 MXU operands): validates the folded-projection algebra tightly.
    out_f32 = jax.block_until_ready(
        cross_attention(x, wq, bq, wk, bk, wv, bv, compute_dtype=jnp.float32))
    assert out_f32.shape == x.shape
    err32 = float(jnp.max(jnp.abs(out_f32 - ref)))
    assert jnp.allclose(out_f32, ref, atol=1e-4, rtol=1e-4), err32

    # Fast path (default): bf16 MXU operands, f32 stats/accumulators.  Tolerance is
    # looser only because of the bf16 operand rounding.
    out_bf16 = jax.block_until_ready(cross_attention(x, wq, bq, wk, bk, wv, bv))
    err16 = float(jnp.max(jnp.abs(out_bf16 - ref)))
    assert jnp.allclose(out_bf16, ref, atol=2e-2, rtol=2e-2), err16

    print("KERNEL_OK")
</pallas_src>

<mosaic_0001>
module attributes {stable_mosaic.version = 11 : i64} {
  func.func @_cross_attention_kernel(%arg0: i32, %arg1: i32, %arg2: i32, %arg3: memref<1x32x64xf32, #tpu.memory_space<vmem>>, %arg4: memref<1x32x64xf32, #tpu.memory_space<vmem>>, %arg5: memref<1x64x32xf32, #tpu.memory_space<vmem>>, %arg6: memref<32x32xf32, #tpu.memory_space<vmem>>, %arg7: memref<32x1xf32, #tpu.memory_space<vmem>>, %arg8: memref<32x32xf32, #tpu.memory_space<vmem>>, %arg9: memref<32x1xf32, #tpu.memory_space<vmem>>, %arg10: memref<1x32x64xf32, #tpu.memory_space<vmem>>, %arg11: memref<1x64xf32, #tpu.memory_space<vmem>>, %arg12: memref<1x64xf32, #tpu.memory_space<vmem>>, %arg13: memref<32x64xf32, #tpu.memory_space<vmem>>, %arg14: memref<32x64xf32, #tpu.memory_space<vmem>>) attributes {dimension_semantics = [#tpu.dimension_semantics<parallel>, #tpu.dimension_semantics<parallel>, #tpu.dimension_semantics<arbitrary>], iteration_bounds = array<i64: 2, 1, 1>, scalar_prefetch = 0 : i64, scratch_operands = 4 : i64, tpu.core_type = #tpu.core_type<tc>, window_params = [{transform_indices = @transform_0, window_bounds = array<i64: 1, 32, 64>}, {transform_indices = @transform_1, window_bounds = array<i64: 1, 32, 64>}, {transform_indices = @transform_2, window_bounds = array<i64: 1, 64, 32>}, {pipeline_mode = #tpu.pipeline_mode<synchronous>, transform_indices = @transform_3, window_bounds = array<i64: 32, 32>}, {pipeline_mode = #tpu.pipeline_mode<synchronous>, transform_indices = @transform_4, window_bounds = array<i64: 32, 1>}, {pipeline_mode = #tpu.pipeline_mode<synchronous>, transform_indices = @transform_5, window_bounds = array<i64: 32, 32>}, {pipeline_mode = #tpu.pipeline_mode<synchronous>, transform_indices = @transform_6, window_bounds = array<i64: 32, 1>}, {transform_indices = @transform_7, window_bounds = array<i64: 1, 32, 64>}]} {
    %c0_i32 = arith.constant 0 : i32
    %0 = arith.cmpi eq, %arg2, %c0_i32 : i32
    %1 = arith.extui %0 : i1 to i32
    %c0_i32_0 = arith.constant 0 : i32
    %2 = arith.cmpi ne, %1, %c0_i32_0 : i32
    scf.if %2 {
      %cst_30 = arith.constant 0xFF800000 : f32
      %39 = vector.broadcast %cst_30 : f32 to vector<1x64xf32>
      %c0_31 = arith.constant 0 : index
      %c0_32 = arith.constant 0 : index
      %40 = vector.load %arg11[%c0_31, %c0_32] : memref<1x64xf32, #tpu.memory_space<vmem>>, vector<1x64xf32>
      tpu.vector_store %arg11[%c0_31, %c0_32], %39 {strides = array<i32>} : memref<1x64xf32, #tpu.memory_space<vmem>>, vector<1x64xf32>,
      %cst_33 = arith.constant 0.000000e+00 : f32
      %41 = vector.broadcast %cst_33 : f32 to vector<1x64xf32>
      %c0_34 = arith.constant 0 : index
      %c0_35 = arith.constant 0 : index
      %42 = vector.load %arg12[%c0_34, %c0_35] : memref<1x64xf32, #tpu.memory_space<vmem>>, vector<1x64xf32>
      tpu.vector_store %arg12[%c0_34, %c0_35], %41 {strides = array<i32>} : memref<1x64xf32, #tpu.memory_space<vmem>>, vector<1x64xf32>,
      %cst_36 = arith.constant 0.000000e+00 : f32
      %43 = vector.broadcast %cst_36 : f32 to vector<32x64xf32>
      %c0_37 = arith.constant 0 : index
      %c0_38 = arith.constant 0 : index
      %44 = vector.load %arg13[%c0_37, %c0_38] : memref<32x64xf32, #tpu.memory_space<vmem>>, vector<32x64xf32>
      tpu.vector_store %arg13[%c0_37, %c0_38], %43 {strides = array<i32>} : memref<32x64xf32, #tpu.memory_space<vmem>>, vector<32x64xf32>,
      %c0_39 = arith.constant 0 : index
      %c0_40 = arith.constant 0 : index
      %c0_41 = arith.constant 0 : index
      %45 = vector.load %arg3[%c0_39, %c0_40, %c0_41] : memref<1x32x64xf32, #tpu.memory_space<vmem>>, vector<1x32x64xf32>
      %46 = vector.shape_cast %45 : vector<1x32x64xf32> to vector<32x64xf32>
      %c0_42 = arith.constant 0 : index
      %c0_43 = arith.constant 0 : index
      %47 = vector.load %arg6[%c0_42, %c0_43] : memref<32x32xf32, #tpu.memory_space<vmem>>, vector<32x32xf32>
      %cst_44 = arith.constant dense<0.000000e+00> : vector<32x64xf32>
      %48 = tpu.matmul %47, %46, %cst_44 {dimension_numbers = #tpu.dot_dimension_numbers<[1], [0], [0], [1], [0, 0, 1, 1], [], []>} : vector<32x32xf32>, vector<32x64xf32>, vector<32x64xf32> -> vector<32x64xf32>
      %c0_45 = arith.constant 0 : index
      %c0_46 = arith.constant 0 : index
      %49 = vector.load %arg7[%c0_45, %c0_46] : memref<32x1xf32, #tpu.memory_space<vmem>>, vector<32x1xf32>
      %50 = vector.broadcast %49 : vector<32x1xf32> to vector<32x64xf32>
      %51 = arith.addf %48, %50 : vector<32x64xf32>
      %c0_47 = arith.constant 0 : index
      %c0_48 = arith.constant 0 : index
      %52 = vector.load %arg14[%c0_47, %c0_48] : memref<32x64xf32, #tpu.memory_space<vmem>>, vector<32x64xf32>
      tpu.vector_store %arg14[%c0_47, %c0_48], %51 {strides = array<i32>} : memref<32x64xf32, #tpu.memory_space<vmem>>, vector<32x64xf32>,
    } else {
    }
    %c0 = arith.constant 0 : index
    %c0_1 = arith.constant 0 : index
    %c0_2 = arith.constant 0 : index
    %3 = vector.load %arg4[%c0, %c0_1, %c0_2] : memref<1x32x64xf32, #tpu.memory_space<vmem>>, vector<1x32x64xf32>
    %4 = vector.shape_cast %3 : vector<1x32x64xf32> to vector<32x64xf32>
    %c0_3 = arith.constant 0 : index
    %c0_4 = arith.constant 0 : index
    %c0_5 = arith.constant 0 : index
    %5 = vector.load %arg5[%c0_3, %c0_4, %c0_5] : memref<1x64x32xf32, #tpu.memory_space<vmem>>, vector<1x64x32xf32>
    %6 = vector.shape_cast %5 : vector<1x64x32xf32> to vector<64x32xf32>
    %c0_6 = arith.constant 0 : index
    %c0_7 = arith.constant 0 : index
    %7 = vector.load %arg8[%c0_6, %c0_7] : memref<32x32xf32, #tpu.memory_space<vmem>>, vector<32x32xf32>
    %cst = arith.constant dense<0.000000e+00> : vector<32x64xf32>
    %8 = tpu.matmul %7, %4, %cst {dimension_numbers = #tpu.dot_dimension_numbers<[1], [0], [0], [1], [0, 0, 1, 1], [], []>} : vector<32x32xf32>, vector<32x64xf32>, vector<32x64xf32> -> vector<32x64xf32>
    %c0_8 = arith.constant 0 : index
    %c0_9 = arith.constant 0 : index
    %9 = vector.load %arg9[%c0_8, %c0_9] : memref<32x1xf32, #tpu.memory_space<vmem>>, vector<32x1xf32>
    %10 = vector.broadcast %9 : vector<32x1xf32> to vector<32x64xf32>
    %11 = arith.addf %8, %10 : vector<32x64xf32>
    %c0_10 = arith.constant 0 : index
    %c0_11 = arith.constant 0 : index
    %12 = vector.load %arg14[%c0_10, %c0_11] : memref<32x64xf32, #tpu.memory_space<vmem>>, vector<32x64xf32>
    %cst_12 = arith.constant dense<0.000000e+00> : vector<64x64xf32>
    %13 = tpu.matmul %6, %12, %cst_12 {dimension_numbers = #tpu.dot_dimension_numbers<[1], [0], [0], [1], [0, 0, 1, 1], [], []>} : vector<64x32xf32>, vector<32x64xf32>, vector<64x64xf32> -> vector<64x64xf32>
    %c0_13 = arith.constant 0 : index
    %c0_14 = arith.constant 0 : index
    %14 = vector.load %arg11[%c0_13, %c0_14] : memref<1x64xf32, #tpu.memory_space<vmem>>, vector<1x64xf32>
    %cst_15 = arith.constant dense<0xFF800000> : vector<64xf32>
    %15 = vector.multi_reduction <maximumf>, %13, %cst_15 [0] : vector<64x64xf32> to vector<64xf32>
    %16 = vector.shape_cast %15 : vector<64xf32> to vector<1x64xf32>
    %17 = arith.maximumf %14, %16 : vector<1x64xf32>
    %18 = arith.subf %14, %17 : vector<1x64xf32>
    %19 = math.exp %18 : vector<1x64xf32>
    %20 = vector.broadcast %17 : vector<1x64xf32> to vector<64x64xf32>
    %21 = arith.subf %13, %20 : vector<64x64xf32>
    %22 = math.exp %21 : vector<64x64xf32>
    %c0_16 = arith.constant 0 : index
    %c0_17 = arith.constant 0 : index
    %23 = vector.load %arg12[%c0_16, %c0_17] : memref<1x64xf32, #tpu.memory_space<vmem>>, vector<1x64xf32>
    %24 = arith.mulf %19, %23 : vector<1x64xf32>
    %cst_18 = arith.constant dense<0.000000e+00> : vector<64xf32>
    %25 = vector.multi_reduction <add>, %22, %cst_18 [0] : vector<64x64xf32> to vector<64xf32>
    %26 = vector.shape_cast %25 : vector<64xf32> to vector<1x64xf32>
    %27 = arith.addf %24, %26 : vector<1x64xf32>
    %c0_19 = arith.constant 0 : index
    %c0_20 = arith.constant 0 : index
    %28 = vector.load %arg12[%c0_19, %c0_20] : memref<1x64xf32, #tpu.memory_space<vmem>>, vector<1x64xf32>
    tpu.vector_store %arg12[%c0_19, %c0_20], %27 {strides = array<i32>} : memref<1x64xf32, #tpu.memory_space<vmem>>, vector<1x64xf32>,
    %c0_21 = arith.constant 0 : index
    %c0_22 = arith.constant 0 : index
    %29 = vector.load %arg11[%c0_21, %c0_22] : memref<1x64xf32, #tpu.memory_space<vmem>>, vector<1x64xf32>
    tpu.vector_store %arg11[%c0_21, %c0_22], %17 {strides = array<i32>} : memref<1x64xf32, #tpu.memory_space<vmem>>, vector<1x64xf32>,
    %c0_23 = arith.constant 0 : index
    %c0_24 = arith.constant 0 : index
    %30 = vector.load %arg13[%c0_23, %c0_24] : memref<32x64xf32, #tpu.memory_space<vmem>>, vector<32x64xf32>
    %31 = vector.broadcast %19 : vector<1x64xf32> to vector<32x64xf32>
    %32 = arith.mulf %31, %30 : vector<32x64xf32>
    %cst_25 = arith.constant dense<0.000000e+00> : vector<32x64xf32>
    %33 = tpu.matmul %11, %22, %cst_25 {dimension_numbers = #tpu.dot_dimension_numbers<[1], [0], [0], [1], [0, 0, 1, 1], [], []>} : vector<32x64xf32>, vector<64x64xf32>, vector<32x64xf32> -> vector<32x64xf32>
    %34 = arith.addf %32, %33 : vector<32x64xf32>
    %c0_26 = arith.constant 0 : index
    %c0_27 = arith.constant 0 : index
    %35 = vector.load %arg13[%c0_26, %c0_27] : memref<32x64xf32, #tpu.memory_space<vmem>>, vector<32x64xf32>
    tpu.vector_store %arg13[%c0_26, %c0_27], %34 {strides = array<i32>} : memref<32x64xf32, #tpu.memory_space<vmem>>, vector<32x64xf32>,
    %c0_i32_28 = arith.constant 0 : i32
    %36 = arith.cmpi eq, %arg2, %c0_i32_28 : i32
    %37 = arith.extui %36 : i1 to i32
    %c0_i32_29 = arith.constant 0 : i32
    %38 = arith.cmpi ne, %37, %c0_i32_29 : i32
    scf.if %38 {
      %c0_30 = arith.constant 0 : index
      %c0_31 = arith.constant 0 : index
      %39 = vector.load %arg12[%c0_30, %c0_31] : memref<1x64xf32, #tpu.memory_space<vmem>>, vector<1x64xf32>
      %40 = tpu.reciprocal %39 : vector<1x64xf32> -> vector<1x64xf32>
      %c0_32 = arith.constant 0 : index
      %c0_33 = arith.constant 0 : index
      %41 = vector.load %arg13[%c0_32, %c0_33] : memref<32x64xf32, #tpu.memory_space<vmem>>, vector<32x64xf32>
      %42 = vector.broadcast %40 : vector<1x64xf32> to vector<32x64xf32>
      %43 = arith.mulf %41, %42 : vector<32x64xf32>
      %c0_34 = arith.constant 0 : index
      %c0_35 = arith.constant 0 : index
      %c0_36 = arith.constant 0 : index
      %44 = vector.load %arg3[%c0_34, %c0_35, %c0_36] : memref<1x32x64xf32, #tpu.memory_space<vmem>>, vector<1x32x64xf32>
      %45 = vector.shape_cast %44 : vector<1x32x64xf32> to vector<32x64xf32>
      %46 = arith.addf %43, %45 : vector<32x64xf32>
      %c0_37 = arith.constant 0 : index
      %c0_38 = arith.constant 0 : index
      %c0_39 = arith.constant 0 : index
      %47 = vector.load %arg10[%c0_37, %c0_38, %c0_39] : memref<1x32x64xf32, #tpu.memory_space<vmem>>, vector<1x32x64xf32>
      %48 = vector.shape_cast %47 : vector<1x32x64xf32> to vector<32x64xf32>
      %49 = vector.shape_cast %46 : vector<32x64xf32> to vector<1x32x64xf32>
      tpu.vector_store %arg10[%c0_37, %c0_38, %c0_39], %49 {strides = array<i32>} : memref<1x32x64xf32, #tpu.memory_space<vmem>>, vector<1x32x64xf32>,
    } else {
    }
    return
  }
  func.func @transform_0(%arg0: i32, %arg1: i32, %arg2: i32) -> (i32, i32, i32) {
    %c0_i32 = arith.constant 0 : i32
    %c0_i32_0 = arith.constant 0 : i32
    return %arg0, %c0_i32, %arg1 : i32, i32, i32
  }
  func.func @transform_1(%arg0: i32, %arg1: i32, %arg2: i32) -> (i32, i32, i32) {
    %c0_i32 = arith.constant 0 : i32
    %c0_i32_0 = arith.constant 0 : i32
    return %arg0, %c0_i32, %arg2 : i32, i32, i32
  }
  func.func @transform_2(%arg0: i32, %arg1: i32, %arg2: i32) -> (i32, i32, i32) {
    %c0_i32 = arith.constant 0 : i32
    %c0_i32_0 = arith.constant 0 : i32
    return %arg0, %arg2, %c0_i32 : i32, i32, i32
  }
  func.func @transform_3(%arg0: i32, %arg1: i32, %arg2: i32) -> (i32, i32) {
    %c0_i32 = arith.constant 0 : i32
    %c0_i32_0 = arith.constant 0 : i32
    %c0_i32_1 = arith.constant 0 : i32
    return %c0_i32, %c0_i32_0 : i32, i32
  }
  func.func @transform_4(%arg0: i32, %arg1: i32, %arg2: i32) -> (i32, i32) {
    %c0_i32 = arith.constant 0 : i32
    %c0_i32_0 = arith.constant 0 : i32
    %c0_i32_1 = arith.constant 0 : i32
    return %c0_i32, %c0_i32_0 : i32, i32
  }
  func.func @transform_5(%arg0: i32, %arg1: i32, %arg2: i32) -> (i32, i32) {
    %c0_i32 = arith.constant 0 : i32
    %c0_i32_0 = arith.constant 0 : i32
    %c0_i32_1 = arith.constant 0 : i32
    return %c0_i32, %c0_i32_0 : i32, i32
  }
  func.func @transform_6(%arg0: i32, %arg1: i32, %arg2: i32) -> (i32, i32) {
    %c0_i32 = arith.constant 0 : i32
    %c0_i32_0 = arith.constant 0 : i32
    %c0_i32_1 = arith.constant 0 : i32
    return %c0_i32, %c0_i32_0 : i32, i32
  }
  func.func @transform_7(%arg0: i32, %arg1: i32, %arg2: i32) -> (i32, i32, i32) {
    %c0_i32 = arith.constant 0 : i32
    %c0_i32_0 = arith.constant 0 : i32
    return %arg0, %c0_i32, %arg1 : i32, i32, i32
  }
}

</mosaic_0001>

<bundles_post_ra>
// kernel: tpu_custom_call.1
= control target key start
LH: loop header
LB: loop body
LE: loop exit
PB: predicated region body
PF: predicated region fallthrough
CT: control target
= control target key end

     0   :  { %12 = vsyncpa [#allocation7], 0  ;;  %s1827_s0 = inlined_call_operand.vmem [shape: f32[2,32,64], index: 0, kind: input, shape index: {}]   ;;  %s1828_s1 = inlined_call_operand.vmem [shape: f32[2,32,64], index: 1, kind: input, shape index: {}]   ;;  %s1829_s2 = inlined_call_operand.vmem [shape: f32[2,64,32], index: 2, kind: input, shape index: {}]   ;;  %s1830_s3 = inlined_call_operand.vmem [shape: f32[32,32], index: 3, kind: input, shape index: {}]   ;;  %s1831_s4 = inlined_call_operand.vmem [shape: f32[32,1], index: 4, kind: input, shape index: {}]   ;;  %s1832_s5 = inlined_call_operand.vmem [shape: f32[32,32], index: 5, kind: input, shape index: {}]   ;;  %s1833_s6 = inlined_call_operand.vmem [shape: f32[32,1], index: 6, kind: input, shape index: {}]   ;;  %s1834_s7 = inlined_call_operand.hbm [shape: f32[2,32,64], index: 7, kind: output, shape index: {}]  }
   0x1   :  { %14 = vsyncpa [#allocation7 + $0x1], 0  ;;  %s1558_s24 = smov 0   ;;  %s1560_s25 = smov 0  }
   0x2   :  { %s1562_s26 = smov 0   ;;  %s1564_s27 = smov 0  }
   0x3   :  { %s1566_s28 = smov 0   ;;  %s1568_s29 = smov 0  }
   0x4 LB: > { %s1159_s30 = sadd.s32 4294967295, %s1510_s29   ;;  %s1160_s8 = sadd.s32 4294967294, %s1510_s29   ;;  %s1510_s29 = sphi %s1568_s29, %s20_s29   ;;  %s1506_s28 = sphi %s1566_s28, %s1844_s28   ;;  %s1502_s27 = sphi %s1564_s27, %s1843_s27   ;;  %s1498_s26 = sphi %s1562_s26, %s1842_s26   ;;  %s1494_s25 = sphi %s1560_s25, %s1841_s25   ;;  %s1490_s24 = sphi %s1558_s24, %s1840_s24  }
   0x5   : > { %s39_s9 = sadd.s32 1, %s1506_s28  ;;  %s216_s10 = sadd.s32 1, %s1498_s26 }
   0x6   : > { %p41_p0 = scmp.ge.s32.totalorder %s39_s9, 2  ;;  %p226_p1 = scmp.ne.s32.totalorder %s1498_s26, %s1494_s25 }
   0x7   : > { %p227_p2 = scmp.eq.s32.totalorder %s1159_s30, 1  ;;  %p232_p3 = scmp.ne.s32.totalorder %s1494_s25, %s1490_s24 }
   0x8   : > { %s1846_s9 = smov (%p41_p0, %s39_s9), 0  ;;  %p233_p5 = scmp.eq.s32.totalorder %s1160_s8, 1 }
   0x9   : > { %1836 = sst [smem:[#allocation9_spill]] %s1846_s9  ;;  %p1598_p4 = por %p227_p2, %p226_p1 }
   0xa   : > { %s211_s12 = ssub.s32 %s1506_s28, %s1846_s9  ;;  %p1163_p6 = scmp.ge.s32.totalorder %s1510_s29, 1 }
   0xb   : > { %p214_p7 = scmp.eq.s32.totalorder %s211_s12, 0  ;;  %p1605_p8 = por %p233_p5, %p232_p3 }
   0xc   : > { %p298_p9 = scmp.lt.s32.totalorder %s1510_s29, 3 }
   0xd   : > { %s1611_s14 = scalar_select %p214_p7, %s1498_s26, %s216_s10  }
   0xe   : > { %p299_p10 = pnand %p1163_p6, %p298_p9 }
   0xf   : > { %p350_p11 = scmp.lt.s32.totalorder (!%p299_p10), %s1502_s27, 1  ;;  %v392_v0 = vld [vmem:[%s1830_s3] sm:$0xff] (!%p299_p10)  ;;  %vm420_vm0 = vcmask (!%p299_p10), 261120   ;;  %v1512_v2 = vmov (!%p299_p10), 0   ;;  %v398_v4 = vld [vmem:[%s1831_s4 + $0x10] sm:$0xff] (!%p299_p10)  ;;  %v397_v5 = vld [vmem:[%s1831_s4 + $0x8] sm:$0xff] (!%p299_p10) }
  0x10   : > { %302 = sbr.rel (%p299_p10) target bundleno = 799 (0x31f), region = 48  ;;  %v534_v1 = vld [vmem:[%s1832_s5] sm:$0xff] (!%p299_p10)  ;;  %1248 = vmatprep.mubr.msk.f32.mxu0 (!%p299_p10), %vm420_vm0, %v392_v0  ;;  %1410 = vset.pattern.permute.xlu0 (!%p299_p10), %v1512_v2  ;;  %v399_v6 = vld [vmem:[%s1831_s4 + $0x18] sm:$0xff] (!%p299_p10)  ;;  %v539_v20 = vld [vmem:[%s1833_s6 + $0x8] sm:$0xff] (!%p299_p10)  ;;  %vm383_vm1 = vcmask (!%p299_p10), 523264   ;;  %vm380_vm2 = vcmask (!%p299_p10), 516096  }
  0x11   : > { %1262 = vmatprep.mubr.msk.f32.mxu1 (!%p299_p10), %vm420_vm0, %v534_v1  ;;  %v396_v3 = vld [vmem:[%s1831_s4] sm:$0xff] (!%p299_p10)  ;;  %1411 = vset.pattern.permute.xlu1 (!%p299_p10), %v1512_v2  ;;  %v540_v21 = vld [vmem:[%s1833_s6 + $0x10] sm:$0xff] (!%p299_p10)  ;;  %v393_v22 = vld [vmem:[%s1830_s3 + $0x8] sm:$0xff] (!%p299_p10)  ;;  %v1513_v61 = vmov (!%p299_p10), -inf   ;;  %v1514_v62 = vmov (!%p299_p10), 0.0   ;;  %s1199_s21 = sshll.u32 (!%p299_p10), %s1502_s27, 9 }
  0x12   : > { %402 = vperm.xlu0 (!%p299_p10), %1410, %v396_v3   ;;  %412 = vperm.xlu1 (!%p299_p10), %1411, %v398_v4   ;;  %v538_v19 = vld [vmem:[%s1833_s6] sm:$0xff] (!%p299_p10)  ;;  %v541_v23 = vld [vmem:[%s1833_s6 + $0x18] sm:$0xff] (!%p299_p10)  ;;  %v535_v24 = vld [vmem:[%s1832_s5 + $0x8] sm:$0xff] (!%p299_p10)  ;;  %381 = vst.msk [vmem:[#allocation2] sm:$0x1] (!%p299_p10), %vm380_vm2, %v1513_v61  ;;  %s1774_s8 = scalar_lea.hbm (!%p299_p10), %s1834_s7, %s1199_s21  ;;  %s1515_s12 = smov (!%p299_p10), [#allocation6]  }
  0x13   : > { %v394_v25 = vld [vmem:[%s1830_s3 + $0x10] sm:$0xff] (!%p299_p10)  ;;  %v395_v27 = vld [vmem:[%s1830_s3 + $0x18] sm:$0xff] (!%p299_p10)  ;;  %382 = vst.msk [vmem:[#allocation3] sm:$0x1] (!%p299_p10), %vm380_vm2, %v1514_v62 }
  0x14   : > { %v536_v26 = vld [vmem:[%s1832_s5 + $0x10] sm:$0xff] (!%p299_p10)  ;;  %v537_v28 = vld [vmem:[%s1832_s5 + $0x18] sm:$0xff] (!%p299_p10)  ;;  %385 = vst.msk [vmem:[#allocation4 + $0x8] sm:$0xff] (!%p299_p10), %vm383_vm1, %v1514_v62  ;;  %384 = vst.msk [vmem:[#allocation4] sm:$0xff] (!%p299_p10), %vm383_vm1, %v1514_v62 }
  0x15   : > { %386 = vst.msk [vmem:[#allocation4 + $0x10] sm:$0xff] (!%p299_p10), %vm383_vm1, %v1514_v62  ;;  %387 = vst.msk [vmem:[#allocation4 + $0x18] sm:$0xff] (!%p299_p10), %vm383_vm1, %v1514_v62 }
  0x16   : > { %407 = vperm.xlu0 (!%p299_p10), %1410, %v397_v5   ;;  %417 = vperm.xlu1 (!%p299_p10), %1411, %v399_v6  }
  0x17   : > { %s1623_s19 = scalar_select %p350_p11, %s1502_s27, 1 }
  0x19   : > { %s1196_s30 = sshll.u32 %s1623_s19, 5  ;;  %s1198_s15 = sshll.u32 %s1623_s19, 6 }
  0x1a   : > { %s357_s16 = scalar_lea.vmem %s1827_s0, %s1196_s30  ;;  %s365_s20 = scalar_lea.vmem %s1828_s1, %s1196_s30  ;;  %544 = vperm.xlu0 %1410, %v538_v19   ;;  %549 = vperm.xlu1 %1411, %v539_v20  }
  0x1b   : > { %v1644_v7 = vld [vmem:[%s357_s16] sm:$0xff]  ;;  %v1646_v8 = vld [vmem:[%s357_s16 + $0x8] sm:$0xff]  ;;  %v1650_v12 = vld [vmem:[%s357_s16 + $0x10] sm:$0xff]  ;;  %s1696_s18 = scalar_lea.vmem %s1829_s2, %s1198_s15  ;;  %s347_s19 = sand.u32 1, %s1494_s25  }
  0x1c   : > { %v522_v9 = vld [vmem:[%s365_s20] sm:$0xff]  ;;  %v1310_v10 = vpack.c.bf16 %v1646_v8, %v1644_v7  ;;  %v523_v11 = vld [vmem:[%s365_s20 + $0x8] sm:$0xff]  ;;  %v1652_v13 = vld [vmem:[%s357_s16 + $0x18] sm:$0xff]  ;;  %s1781_s27 = scalar_lea.sflag [#allocation7], %s347_s19  ;;  %s1436_s15 = sshll.u32 %s1515_s12, 4  ;;  %s1437_s15 = int_to_ptr.vmem [resolvable:$false] %s1436_s15 }
  0x1d   : > { %v1318_v14 = vpack.c.bf16 %v523_v11, %v522_v9  ;;  %v1314_v15 = vpack.c.bf16 %v1652_v13, %v1650_v12  ;;  %v524_v16 = vld [vmem:[%s365_s20 + $0x10] sm:$0xff]  ;;  %v525_v17 = vld [vmem:[%s365_s20 + $0x18] sm:$0xff]  ;;  %v526_v29 = vld [vmem:[%s1696_s18] sm:$0xff]  ;;  %s1164_s20 = sshll.u32 %s347_s19, 5  ;;  %s1438_s16 = scalar_lea.vmem %s1437_s15, 1024 }
  0x1e   : > { %1311 = vmatprep.subr.bf16.mxu0 %v1310_v10  ;;  %v1322_v18 = vpack.c.bf16 %v525_v17, %v524_v16  ;;  %554 = vperm.xlu0 %1410, %v540_v21   ;;  %v527_v54 = vld [vmem:[%s1696_s18 + $0x8] sm:$0xff]  ;;  %v528_v55 = vld [vmem:[%s1696_s18 + $0x10] sm:$0xff]  ;;  %v529_v56 = vld [vmem:[%s1696_s18 + $0x18] sm:$0xff]  ;;  %s349_s9 = scalar_lea.vmem [#allocation6], %s1164_s20 }
  0x1f   : > { %1319 = vmatprep.subr.bf16.mxu1 %v1318_v14  ;;  %1313 = vmatpush3.bf16.msra.mxu0 %v1310_v10  ;;  %v530_v57 = vld [vmem:[%s1696_s18 + $0x20] sm:$0xff]  ;;  %v531_v58 = vld [vmem:[%s1696_s18 + $0x28] sm:$0xff]  ;;  %v532_v59 = vld [vmem:[%s1696_s18 + $0x30] sm:$0xff]  ;;  %s1042_s22 = sshll.u32 %s349_s9, 4  ;;  %s1776_s22 = int_to_ptr.vmem [resolvable:$true] %s1042_s22 }
  0x20   : > { %1321 = vmatpush3.bf16.msra.mxu1 %v1318_v14  ;;  %1315 = vmatprep.subr.bf16.mxu0 %v1314_v15  ;;  %v533_v60 = vld [vmem:[%s1696_s18 + $0x38] sm:$0xff]  ;;  %s1432_s10 = scalar_lea.vmem %s1776_s22, 512  ;;  %p1439_p1 = scmp.lt.s32.totalorder %s1776_s22, %s1437_s15 }
  0x21   : > { %1323 = vmatprep.subr.bf16.mxu1 %v1322_v18  ;;  %559 = vperm.xlu1 %1411, %v541_v23   ;;  %p1433_p12 = scmp.ne.s32.totalorder %s1776_s22, %s1432_s10  ;;  %p1440_p2 = scmp.lt.s32.totalorder %s1438_s16, %s1432_s10 }
  0x23   : > { %1317 = vmatpush3.bf16.msra.mxu0 %v1314_v15  ;;  %p1434_p13 = pnand %p1433_p12, %p1598_p4  ;;  %p1441_p3 = por %p1440_p2, %p1439_p1 }
  0x24   : > { %1325 = vmatpush3.bf16.msra.mxu1 %v1322_v18 }
  0x25   : > { %p1435_p0 = pneg %p1434_p13 }
  0x26   : > { %1249 = vmatmul.mubr.msk.f32.vlgmr.msra.gmra.mrb[0].mxu0 %vm420_vm0, %v393_v22 }
  0x27   : > { %1263 = vmatmul.mubr.msk.f32.vlgmr.msra.gmra.mrb[0].mxu1 %vm420_vm0, %v535_v24  ;;  %1251 = vmatprep.mubr.msk.f32.mxu0 %vm420_vm0, %v394_v25  ;;  %p1442_p5 = pnand %p1441_p3, %p1435_p0 }
  0x28   : > { %1265 = vmatprep.mubr.msk.f32.mxu1 %vm420_vm0, %v536_v26 }
  0x2a   : > { %1252 = vmatmul.mubr.msk.f32.gmra.mrb[2].mxu0 %vm420_vm0, %v395_v27 }
  0x2b   : > { %1266 = vmatmul.mubr.msk.f32.gmra.mrb[2].mxu1 %vm420_vm0, %v537_v28  ;;  %1276 = vmatprep.mubr.msk.f32.mxu0 %vm420_vm0, %v526_v29  ;;  %v821_v28 = vlaneseq }
  0x91   : > { %v403_v30 = vpop.permute.xlu0 %402  ;;  %v413_v32 = vpop.permute.xlu1 %412 }
  0x95   : > { %v408_v31 = vpop.permute.xlu0 %407  ;;  %v418_v41 = vpop.permute.xlu1 %417 }
  0x99   : > { %v545_v37 = vpop.permute.xlu0 %544 }
  0xf9   : > { %v1250_v33 = vpop.f32.mrb[0].mxu0 }
  0xfa   : > { %v505_v34 = vadd.f32 %v1250_v33, %v408_v31  ;;  %v1700_v35 = vpop.f32.mrb[0].mxu1  ;;  %v499_v36 = vpop.f32.mrb[1].mxu0  ;;  %v822_v31 = vshrl.u32 %v821_v28, 7  ;;  %v793_v33 = vld [vmem:[#allocation2] sm:$0x1] }
  0xfb   : > { %v500_v38 = vadd.f32 %v499_v36, %v403_v30  ;;  %v641_v39 = vpop.f32.mrb[1].mxu1  ;;  %v555_v28 = vpop.permute.xlu0 %554 }
  0xfc   : > { %519 = vst.msk [vmem:[#allocation5 + $0x8] sm:$0xff] %vm383_vm1, %v505_v34  ;;  %v642_v40 = vadd.f32 %v641_v39, %v545_v37  ;;  %v1739_v36 = vsub.s32 0, %v822_v31 }
  0xfd   : > { %518 = vst.msk [vmem:[#allocation5] sm:$0xff] %vm383_vm1, %v500_v38  ;;  %v1253_v42 = vpop.f32.mrb[2].mxu0 }
  0xfe   : > { %v515_v43 = vadd.f32 %v1253_v42, %v418_v41  ;;  %v1704_v44 = vpop.f32.mrb[2].mxu1  ;;  %1304 = vmatprep.mubr.msk.f32.mxu1 %vm383_vm1, %v642_v40  ;;  %v509_v45 = vpop.f32.mrb[3].mxu0 }
  0xff   : > { %v510_v46 = vadd.f32 %v509_v45, %v413_v32  ;;  %v1707_v47 = vpop.f32.mrb[3].mxu1 }
 0x100   : > { %521 = vst.msk [vmem:[#allocation5 + $0x18] sm:$0xff] %vm383_vm1, %v515_v43 }
 0x101   : > { %520 = vst.msk [vmem:[#allocation5 + $0x10] sm:$0xff] %vm383_vm1, %v510_v46 }
 0x103   : > { %v661_v48 = vld [vmem:[#allocation5 + $0x8] sm:$0xff] }
 0x104   : > { %v660_v49 = vld [vmem:[#allocation5] sm:$0xff] }
 0x105   : > { %v1326_v50 = vpack.c.bf16 %v661_v48, %v660_v49 }
 0x107   : > { %1327 = vmatprep.subr.bf16.mxu0 %v1326_v50  ;;  %v663_v51 = vld [vmem:[#allocation5 + $0x18] sm:$0xff] }
 0x108   : > { %1329 = vmatpush3.bf16.msra.mxu0 %v1326_v50  ;;  %v662_v52 = vld [vmem:[#allocation5 + $0x10] sm:$0xff] }
 0x109   : > { %v1330_v53 = vpack.c.bf16 %v663_v51, %v662_v52 }
 0x10b   : > { %1331 = vmatprep.subr.bf16.mxu0 %v1330_v53 }
 0x10c   : > { %1333 = vmatpush3.bf16.msra.mxu0 %v1330_v53 }
 0x10f   : > { %1277 = vmatmul.mubr.msk.f32.vlgmr.msra.gmra.mrb[4].mxu0 %vm420_vm0, %v527_v54 }
 0x110   : > { %1279 = vmatprep.mubr.msk.f32.mxu0 %vm420_vm0, %v528_v55 }
 0x113   : > { %1280 = vmatmul.mubr.msk.f32.gmra.mrb[6].mxu0 %vm420_vm0, %v529_v56 }
 0x114   : > { %1282 = vmatprep.mubr.msk.f32.mxu0 %vm420_vm0, %v530_v57 }
 0x117   : > { %1283 = vmatmul.mubr.msk.f32.gmra.mrb[8].mxu0 %vm420_vm0, %v531_v58 }
 0x118   : > { %1285 = vmatprep.mubr.msk.f32.mxu0 %vm420_vm0, %v532_v59 }
 0x11b   : > { %1286 = vmatmul.mubr.msk.f32.gmra.mrb[10].mxu0 %vm420_vm0, %v533_v60 }
 0x1e2   : > { %v1278_v63 = vpop.f32.mrb[4].mxu0 }
 0x1e3   : > { %v754_v0 = vpop.f32.mrb[5].mxu0  ;;  %v796_v4 = vsel %vm383_vm1, %v1278_v63, -inf }
 0x1e4   : > { %v795_v9 = vsel %vm383_vm1, %v754_v0, -inf }
 0x1e6   : > { %v1281_v1 = vpop.f32.mrb[6].mxu0 }
 0x1e7   : > { %v764_v2 = vpop.f32.mrb[7].mxu0  ;;  %v798_v16 = vsel %vm383_vm1, %v1281_v1, -inf }
 0x1e8   : > { %v797_v20 = vsel %vm383_vm1, %v764_v2, -inf }
 0x1ea   : > { %v1284_v3 = vpop.f32.mrb[8].mxu0 }
 0x1eb   : > { %v801_v5 = vsel %vm383_vm1, %v1284_v3, -inf  ;;  %v774_v6 = vpop.f32.mrb[9].mxu0 }
 0x1ec   : > { %v802_v10 = vmax.f32 %v796_v4, %v801_v5  ;;  %v799_v11 = vsel %vm383_vm1, %v774_v6, -inf }
 0x1ed   : > { %v800_v14 = vmax.f32 %v795_v9, %v799_v11 }
 0x1ee   : > { %v1287_v15 = vpop.f32.mrb[10].mxu0 }
 0x1ef   : > { %v807_v17 = vmax.f32 %v800_v14, %v802_v10  ;;  %v805_v18 = vsel %vm383_vm1, %v1287_v15, -inf  ;;  %v784_v19 = vpop.f32.mrb[11].mxu0 }
 0x1f0   : > { %v806_v21 = vmax.f32 %v798_v16, %v805_v18  ;;  %v803_v22 = vsel %vm383_vm1, %v784_v19, -inf }
 0x1f1   : > { %v804_v23 = vmax.f32 %v797_v20, %v803_v22 }
 0x1f3   : > { %v808_v24 = vmax.f32 %v804_v23, %v806_v21 }
 0x1f5   : > { %v809_v25 = vmax.f32 %v807_v17, %v808_v24 }
 0x1f7   : > { %v810_v26 = vrot.slane %v809_v25, 4 }
 0x1f9   : > { %v811_v27 = vmax.f32 %v809_v25, %v810_v26  ;;  %v550_v25 = vpop.permute.xlu1 %549 }
 0x1fb   : > { %v812_v29 = vrot.slane %v811_v27, 2 }
 0x1fd   : > { %v813_v30 = vmax.f32 %v811_v27, %v812_v29  ;;  %v647_v29 = vadd.f32 %v1700_v35, %v550_v25 }
 0x1ff   : > { %v814_v32 = vrot.slane %v813_v30, 1 }
 0x201   : > { %v815_v34 = vmax.f32 %v813_v30, %v814_v32  ;;  %v652_v30 = vadd.f32 %v1707_v47, %v555_v28  ;;  %v560_v32 = vpop.permute.xlu1 %559 }
 0x203   : > { %v816_v37 = vmax.f32 %v793_v33, %v815_v34  ;;  %v657_v34 = vadd.f32 %v1704_v44, %v560_v32 }
 0x205   : > { %v824_v38 = vrot.slane %v816_v37, %v1739_v36  ;;  %876 = vst.msk [vmem:[#allocation2] sm:$0x1] %vm380_vm2, %v816_v37  ;;  %v817_v9 = vsub.f32 %v793_v33, %v816_v37 }
 0x207   : > { %v826_v39 = vsub.f32 %v754_v0, %v824_v38  ;;  %v827_v40 = vsub.f32 %v1278_v63, %v824_v38  ;;  %v828_v41 = vsub.f32 %v764_v2, %v824_v38  ;;  %v829_v42 = vsub.f32 %v1281_v1, %v824_v38 }
 0x208   : > { %v830_v43 = vsub.f32 %v774_v6, %v824_v38  ;;  %v831_v45 = vsub.f32 %v1284_v3, %v824_v38  ;;  %v832_v46 = vsub.f32 %v784_v19, %v824_v38  ;;  %v833_v52 = vsub.f32 %v1287_v15, %v824_v38 }
 0x209   : > { %v834_v48 = vmul.f32 1.442695, %v826_v39  ;;  %v836_v49 = vmul.f32 1.442695, %v827_v40  ;;  %v838_v50 = vmul.f32 1.442695, %v828_v41 }
 0x20a   : > { %v840_v51 = vmul.f32 1.442695, %v829_v42  ;;  %v842_v53 = vmul.f32 1.442695, %v830_v43  ;;  %v844_v54 = vmul.f32 1.442695, %v831_v45 }
 0x20b   : > { %1412 = vpow2.f32 %v834_v48  ;;  %v846_v55 = vmul.f32 1.442695, %v832_v46  ;;  %v848_v56 = vmul.f32 1.442695, %v833_v52  ;;  %v818_v19 = vmul.f32 1.442695, %v817_v9 }
 0x20c   : > { %1414 = vpow2.f32 %v836_v49  ;;  %v850_v39 = vld [vmem:[#allocation3] sm:$0x1]  ;;  %v878_v45 = vld [vmem:[#allocation4 + $0x8] sm:$0xff]  ;;  %v877_v46 = vld [vmem:[#allocation4] sm:$0xff] }
 0x20d   : > { %1416 = vpow2.f32 %v838_v50  ;;  %v880_v50 = vld [vmem:[#allocation4 + $0x18] sm:$0xff] }
 0x20e   : > { %1418 = vpow2.f32 %v840_v51 }
 0x20f   : > { %1420 = vpow2.f32 %v842_v53  ;;  %v879_v53 = vld [vmem:[#allocation4 + $0x10] sm:$0xff] }
 0x210   : > { %1422 = vpow2.f32 %v844_v54 }
 0x211   : > { %1424 = vpow2.f32 %v846_v55 }
 0x212   : > { %1426 = vpow2.f32 %v848_v56 }
 0x213   : > { %1428 = vpow2.f32 %v818_v19 }
 0x215   : > { %v1413_v57 = vpop.eup %1412 }
 0x216   : > { %v1415_v58 = vpop.eup %1414  ;;  %v852_v59 = vsel %vm383_vm1, %v1413_v57, 0.0 }
 0x217   : > { %v1417_v60 = vpop.eup %1416  ;;  %v853_v61 = vsel %vm383_vm1, %v1415_v58, 0.0  ;;  %v1334_v62 = vpack.c.bf16 %v1415_v58, %v1413_v57 }
 0x218   : > { %v1419_v63 = vpop.eup %1418  ;;  %v854_v0 = vadd.f32 %v853_v61, %v852_v59  ;;  %v855_v2 = vsel %vm383_vm1, %v1417_v60, 0.0 }
 0x219   : > { %v1421_v1 = vpop.eup %1420  ;;  %1335 = vmatprep.subr.bf16.mxu1 %v1334_v62  ;;  %v1338_v3 = vpack.c.bf16 %v1419_v63, %v1417_v60  ;;  %v857_v10 = vsel %vm383_vm1, %v1419_v63, 0.0 }
 0x21a   : > { %v1423_v4 = vpop.eup %1422  ;;  %v856_v5 = vadd.f32 %v855_v2, %v854_v0  ;;  %1337 = vmatpush3.bf16.msra.mxu1 %v1334_v62  ;;  %v859_v16 = vsel %vm383_vm1, %v1421_v1, 0.0 }
 0x21b   : > { %v1425_v6 = vpop.eup %1424  ;;  %1339 = vmatprep.subr.bf16.mxu1 %v1338_v3  ;;  %v1342_v11 = vpack.c.bf16 %v1423_v4, %v1421_v1  ;;  %v861_v20 = vsel %vm383_vm1, %v1423_v4, 0.0 }
 0x21c   : > { %v1427_v14 = vpop.eup %1426  ;;  %v858_v15 = vadd.f32 %v857_v10, %v856_v5  ;;  %v863_v22 = vsel %vm383_vm1, %v1425_v6, 0.0 }
 0x21d   : > { %v1346_v17 = vpack.c.bf16 %v1427_v14, %v1425_v6  ;;  %v865_v24 = vsel %vm383_vm1, %v1427_v14, 0.0  ;;  %v1429_v38 = vpop.eup %1428 }
 0x21e   : > { %v860_v18 = vadd.f32 %v859_v16, %v858_v15  ;;  %1341 = vmatpush3.bf16.msra.mxu1 %v1338_v3  ;;  %v851_v42 = vmul.f32 %v1429_v38, %v850_v39  ;;  %v885_v43 = vrot.slane %v1429_v38, %v1739_v36 }
 0x21f   : > { %1343 = vmatprep.subr.bf16.mxu1 %v1342_v11 }
 0x220   : > { %v862_v21 = vadd.f32 %v861_v20, %v860_v18  ;;  %v888_v48 = vmul.f32 %v885_v43, %v878_v45  ;;  %v887_v44 = vmul.f32 %v885_v43, %v877_v46  ;;  %v890_v55 = vmul.f32 %v885_v43, %v880_v50 }
 0x221   : > { %v889_v57 = vmul.f32 %v885_v43, %v879_v53 }
 0x222   : > { %v864_v23 = vadd.f32 %v863_v22, %v862_v21  ;;  %1345 = vmatpush3.bf16.msra.mxu1 %v1342_v11 }
 0x223   : > { %1347 = vmatprep.subr.bf16.mxu1 %v1346_v17 }
 0x224   : > { %v866_v26 = vadd.f32 %v865_v24, %v864_v23 }
 0x226   : > { %v867_v27 = vrot.slane %v866_v26, 4  ;;  %1349 = vmatpush3.bf16.msra.mxu1 %v1346_v17 }
 0x228   : > { %v868_v31 = vadd.f32 %v867_v27, %v866_v26 }
 0x229   : > { %1305 = vmatmul.mubr.msk.f32.vlgmr.msra.gmra.mrb[4].mxu1 %vm383_vm1, %v647_v29 }
 0x22a   : > { %v869_v33 = vrot.slane %v868_v31, 2  ;;  %1307 = vmatprep.mubr.msk.f32.mxu1 %vm383_vm1, %v652_v30 }
 0x22c   : > { %v870_v37 = vadd.f32 %v869_v33, %v868_v31 }
 0x22d   : > { %1308 = vmatmul.mubr.msk.f32.gmra.mrb[6].mxu1 %vm383_vm1, %v657_v34 }
 0x22e   : > { %v871_v40 = vrot.slane %v870_v37, 1 }
 0x230   : > { %v872_v41 = vadd.f32 %v871_v40, %v870_v37 }
 0x232   : > { %v873_v35 = vadd.f32 %v872_v41, %v851_v42 }
 0x234   : > { %875 = vst.msk [vmem:[#allocation3] sm:$0x1] %vm380_vm2, %v873_v35 }
 0x23b   : > { %v999_v47 = vld [vmem:[#allocation3] sm:$0x1] }
 0x23c   : > { %1430 = vrcp.f32 %v999_v47 }
 0x246   : > { %v1431_v60 = vpop.eup %1430 }
 0x247   : > { %v1009_v62 = vrot.slane %v1431_v60, %v1739_v36 }
 0x2fc   : > { %v1306_v49 = vpop.f32.mrb[4].mxu1 }
 0x2fd   : > { %v989_v51 = vadd.f32 %v1306_v49, %v888_v48  ;;  %v969_v52 = vpop.f32.mrb[5].mxu1 }
 0x2fe   : > { %v988_v54 = vadd.f32 %v969_v52, %v887_v44 }
 0x2ff   : > { %993 = vst.msk [vmem:[#allocation4 + $0x8] sm:$0xff] %vm383_vm1, %v989_v51 }
 0x300   : > { %992 = vst.msk [vmem:[#allocation4] sm:$0xff] %vm383_vm1, %v988_v54  ;;  %v1309_v56 = vpop.f32.mrb[6].mxu1 }
 0x301   : > { %v991_v58 = vadd.f32 %v1309_v56, %v890_v55  ;;  %v979_v59 = vpop.f32.mrb[7].mxu1 }
 0x302   : > { %v990_v61 = vadd.f32 %v979_v59, %v889_v57 }
 0x303   : > { %995 = vst.msk [vmem:[#allocation4 + $0x18] sm:$0xff] %vm383_vm1, %v991_v58 }
 0x304   : > { %994 = vst.msk [vmem:[#allocation4 + $0x10] sm:$0xff] %vm383_vm1, %v990_v61 }
 0x306   : > { %v1002_v63 = vld [vmem:[#allocation4 + $0x8] sm:$0xff] }
 0x307   : > { %v1001_v0 = vld [vmem:[#allocation4] sm:$0xff]  ;;  %v1012_v1 = vmul.f32 %v1009_v62, %v1002_v63 }
 0x308   : > { %v1011_v2 = vmul.f32 %v1009_v62, %v1001_v0 }
 0x309   : > { %v1020_v3 = vadd.f32 %v1012_v1, %v1646_v8 }
 0x30a   : > { %v1004_v4 = vld [vmem:[#allocation4 + $0x18] sm:$0xff]  ;;  %v1019_v5 = vadd.f32 %v1011_v2, %v1644_v7 }
 0x30b   : > { %v1003_v6 = vld [vmem:[#allocation4 + $0x10] sm:$0xff]  ;;  %v1014_v9 = vmul.f32 %v1009_v62, %v1004_v4  ;;  %1024 = vst.msk [vmem:[%s349_s9 + $0x8] sm:$0xff] %vm383_vm1, %v1020_v3 }
 0x30c   : > { %v1013_v10 = vmul.f32 %v1009_v62, %v1003_v6  ;;  %1023 = vst.msk [vmem:[%s349_s9] sm:$0xff] %vm383_vm1, %v1019_v5 }
 0x30d   : > { %v1022_v36 = vadd.f32 %v1014_v9, %v1652_v13 }
 0x30e   : > { %v1021_v7 = vadd.f32 %v1013_v10, %v1650_v12 }
 0x30f   : > { %1026 = vst.msk [vmem:[%s349_s9 + $0x18] sm:$0xff] %vm383_vm1, %v1022_v36 }
 0x310   : > { %1025 = vst.msk [vmem:[%s349_s9 + $0x10] sm:$0xff] %vm383_vm1, %v1021_v7 }
 0x311   : > { %1445 = shalt.err (!%p1442_p5)
}
 0x312   : > { %s1446_s17 = scalar_lea.hbm %s1774_s8, 512  ;;  %s1450_s20 = scalar_lea.hbm %s1834_s7, 1024 }
 0x313   : > { %p1447_p6 = scmp.ne.s32.totalorder %s1774_s8, %s1446_s17  ;;  %p1451_p10 = scmp.lt.u32.totalorder %s1774_s8, %s1834_s7 }
 0x314   : > { %p1452_p11 = scmp.lt.u32.totalorder %s1450_s20, %s1446_s17  ;;  %p1454_p13 = scmp.lt.u32.totalorder %s1446_s17, %s1774_s8 }
 0x315   : > { %p1448_p7 = pnand %p1447_p6, %p1598_p4 }
 0x316   : > { %p1453_p12 = por %p1452_p11, %p1451_p10 }
 0x317   : > { %p1449_p9 = pneg %p1448_p7 }
 0x318   : > { %p1455_p0 = por %p1454_p13, %p1453_p12 }
 0x31a   : > { %p1456_p1 = pnand %p1455_p0, %p1449_p9 }
 0x31c   : > { %1459 = shalt.err (!%p1456_p1)
}
 0x31d   : > { %s1516_s23 = smov 128   ;;  %s1517_s30 = smov 8  }
 0x31e   : > { %1350 = dma.vmem_to_hbm [thread:$0]  (%p1598_p4), %s1776_s22, 512, %s1774_s8, %s1781_s27, %s1516_s23, %s1516_s23, %s1517_s30  }
 0x31f PF: > { %p1356_p2 = scmp.ge.s32.totalorder %s1510_s29, 2  ;;  %s1057_s10 = sand.u32 1, %s1490_s24  }
 0x320   : > { %s1058_s12 = scalar_lea.sflag [#allocation7], %s1057_s10 }
 0x321   : > { %p1353_p3 = pnand %p1356_p2, %p1605_p8 }
 0x323   : > { %1485 = dma.done.wait (!%p1353_p3), %s1058_s12, 512  }
 0x324   : > { %1487 = vsyncadd (!%p1353_p3), %s1058_s12, 4294966784  ;;  %s20_s29 = sadd.s32 1, %s1510_s29   ;;  %s1839_s11 = sld [smem:[#allocation9_spill]] }
 0x325   : > { %p17_p5 = scmp.ge.s32.totalorder %s20_s29, 4   ;;  %s1840_s24 = smov %s1494_s25 }
 0x326   : > { %s1841_s25 = smov %s1498_s26  ;;  %s1842_s26 = smov %s1611_s14 }
 0x327   : > { %s1843_s27 = smov %s1506_s28  ;;  %19 = sbr.rel (!%p17_p5) target bundleno = 4 (0x4), region = 97 }
 0x32a   : > { %s1844_s28 = smov %s1839_s11 }
 0x32e   :  { %1063 = vsyncpa [#allocation7], 1 }
 0x32f   :  { %1065 = vsyncpa [#allocation7 + $0x1], 1 }

</bundles_post_ra>
